<compile_context>
chip_gen: v7x
topology: tpu7x:2x2x1
jax: 0.10.0
libtpu: 0.0.40
codegen_flags: <defaults>
</compile_context>

<pallas_src>
import functools

import jax
import jax.numpy as jnp
from jax import lax
from jax.experimental import pallas as pl
from jax.experimental.pallas import tpu as pltpu


def _spread_loss_kernel(ai_ref, tgt_ref, out_ref, *, margin, batch, tb, inv_batch):
    """One batch tile.

    ai_ref : (E, tb) f32  VMEM  — classes on sublanes, batch on lanes
    tgt_ref: (1, tb) i32  VMEM  — lane-dense targets
    out_ref: (1, 1)  f32  SMEM  — running sum / final loss (accumulator)
    """
    pid = pl.program_id(0)

    @pl.when(pid == 0)
    def _init():
        out_ref[0, 0] = 0.0

    ai = ai_ref[...]                                     # (E, tb) f32
    tgt = tgt_ref[...]                                   # (1, tb) i32
    E = ai.shape[0]

    # One-hot gather of the target activation a_t per column (no dynamic
    # gather: sublane iota compared against the broadcast target row).
    row = lax.broadcasted_iota(jnp.int32, (E, tb), 0)    # (E, tb)
    onehot = row == tgt                                  # (E, tb) bool
    at = jnp.sum(jnp.where(onehot, ai, 0.0), axis=0, keepdims=True)  # (1, tb)

    diff = margin - (at - ai)                            # (E, tb)
    hinge = jnp.maximum(diff, 0.0)
    per_col = jnp.sum(hinge * hinge, axis=0, keepdims=True)          # (1, tb)

    # Mask lanes that belong to batch padding (global column index >= batch).
    col = lax.broadcasted_iota(jnp.int32, (1, tb), 1) + pid * tb
    partial = jnp.sum(jnp.where(col < batch, per_col, 0.0))

    out_ref[0, 0] += partial

    @pl.when(pid == pl.num_programs(0) - 1)
    def _finalize():
        out_ref[0, 0] = out_ref[0, 0] * inv_batch - margin * margin


def spread_loss(ai, target, margin, *, tb_max=8192):
    """Pallas TPU implementation of SpreadLoss.forward(ai, target)."""
    b, E = ai.shape

    # Transpose to (E, b): classes on sublanes, batch on lanes (lane-dense).
    ai_t = jnp.transpose(ai.astype(jnp.float32))         # (E, b)
    tgt = target.astype(jnp.int32).reshape(1, b)         # (1, b)

    # Batch tile: multiple of 128 lanes, capped at tb_max; pad batch to a
    # multiple of the tile (padding is masked inside the kernel).
    lane = 128
    tb = min(tb_max, ((b + lane - 1) // lane) * lane)
    nb = pl.cdiv(b, tb)
    b_pad = nb * tb
    if b_pad != b:
        ai_t = jnp.pad(ai_t, ((0, 0), (0, b_pad - b)))
        tgt = jnp.pad(tgt, ((0, 0), (0, b_pad - b)))

    kernel = functools.partial(
        _spread_loss_kernel,
        margin=float(margin),
        batch=int(b),
        tb=int(tb),
        inv_batch=1.0 / float(b),
    )

    out = pl.pallas_call(
        kernel,
        out_shape=jax.ShapeDtypeStruct((1, 1), jnp.float32),
        grid=(nb,),
        in_specs=[
            pl.BlockSpec((E, tb), lambda i: (0, i)),     # ai (E, b_pad) tile
            pl.BlockSpec((1, tb), lambda i: (0, i)),     # target (1, b_pad) tile
        ],
        out_specs=pl.BlockSpec(
            (1, 1), lambda i: (0, 0), memory_space=pltpu.MemorySpace.SMEM
        ),
        compiler_params=pltpu.CompilerParams(
            dimension_semantics=("arbitrary",),          # output is an accumulator
            vmem_limit_bytes=32 * 1024 * 1024,           # safe on v5e/v6e/v7x
        ),
    )(ai_t, tgt)
    return out[0, 0]


def _spread_loss_ref(ai, target, margin):
    """Pure-JAX reference mirroring the PyTorch forward exactly."""
    b, E = ai.shape
    at = ai[jnp.arange(b), target].reshape(b, 1)
    loss = jnp.maximum(margin - (at - ai), 0.0) ** 2
    return jnp.sum(loss) / b - margin**2


if __name__ == "__main__":
    # args.num_classes = 10, args.m_min = 0.2 (deterministic, in-script)
    num_classes = 10
    margin = 0.2
    batch = 8

    key = jax.random.PRNGKey(0)
    k_ai, k_tgt = jax.random.split(key)
    ai = jax.random.uniform(k_ai, (batch, num_classes), dtype=jnp.float32)
    target = jax.random.randint(k_tgt, (batch,), 0, num_classes, dtype=jnp.int32)

    out = spread_loss(ai, target, margin)
    out = jax.block_until_ready(out)
    ref = _spread_loss_ref(ai, target, margin)
    assert jnp.allclose(out, ref, atol=1e-5, rtol=1e-5), (out, ref)

    # Second check: non-multiple batch with multiple grid steps (exercises the
    # accumulator across tiles and the padding mask).
    b2 = 200
    k_ai2, k_tgt2 = jax.random.split(jax.random.PRNGKey(0), 2)
    ai2 = jax.random.uniform(k_ai2, (b2, num_classes), dtype=jnp.float32)
    tgt2 = jax.random.randint(k_tgt2, (b2,), 0, num_classes, dtype=jnp.int32)
    out2 = jax.block_until_ready(spread_loss(ai2, tgt2, margin, tb_max=128))
    ref2 = _spread_loss_ref(ai2, tgt2, margin)
    assert jnp.allclose(out2, ref2, atol=1e-5, rtol=1e-5), (out2, ref2)

    print("KERNEL_OK")
</pallas_src>

<mosaic_0001>
module attributes {stable_mosaic.version = 11 : i64} {
  func.func @_spread_loss_kernel(%arg0: i32, %arg1: memref<10x128xf32, #tpu.memory_space<vmem>>, %arg2: memref<1x128xi32, #tpu.memory_space<vmem>>, %arg3: memref<1x1xf32, #tpu.memory_space<smem>>) attributes {dimension_semantics = [#tpu.dimension_semantics<arbitrary>], iteration_bounds = array<i64: 1>, scalar_prefetch = 0 : i64, scratch_operands = 0 : i64, tpu.core_type = #tpu.core_type<tc>, window_params = [{transform_indices = @transform_0, window_bounds = array<i64: 10, 128>}, {transform_indices = @transform_1, window_bounds = array<i64: 1, 128>}, {transform_indices = @transform_2, window_bounds = array<i64: 1, 1>}]} {
    %c0_i32 = arith.constant 0 : i32
    %0 = arith.cmpi eq, %arg0, %c0_i32 : i32
    %1 = arith.extui %0 : i1 to i32
    %c0_i32_0 = arith.constant 0 : i32
    %2 = arith.cmpi ne, %1, %c0_i32_0 : i32
    scf.if %2 {
      %cst_16 = arith.constant 0.000000e+00 : f32
      %c0_17 = arith.constant 0 : index
      %c0_18 = arith.constant 0 : index
      %39 = memref.load %arg3[%c0_17, %c0_18] : memref<1x1xf32, #tpu.memory_space<smem>>
      memref.store %cst_16, %arg3[%c0_17, %c0_18] : memref<1x1xf32, #tpu.memory_space<smem>>
    } else {
    }
    %c0 = arith.constant 0 : index
    %c0_1 = arith.constant 0 : index
    %3 = vector.load %arg1[%c0, %c0_1] : memref<10x128xf32, #tpu.memory_space<vmem>>, vector<10x128xf32>
    %c0_2 = arith.constant 0 : index
    %c0_3 = arith.constant 0 : index
    %4 = vector.load %arg2[%c0_2, %c0_3] : memref<1x128xi32, #tpu.memory_space<vmem>>, vector<1x128xi32>
    %5 = tpu.iota {dimensions = array<i32: 0>} : vector<10x128xi32>
    %6 = vector.broadcast %4 : vector<1x128xi32> to vector<10x128xi32>
    %7 = arith.cmpi eq, %5, %6 : vector<10x128xi32>
    %cst = arith.constant 0.000000e+00 : f32
    %8 = vector.broadcast %cst : f32 to vector<10x128xf32>
    %9 = arith.select %7, %3, %8 : vector<10x128xi1>, vector<10x128xf32>
    %cst_4 = arith.constant dense<0.000000e+00> : vector<128xf32>
    %10 = vector.multi_reduction <add>, %9, %cst_4 [0] : vector<10x128xf32> to vector<128xf32>
    %11 = vector.shape_cast %10 : vector<128xf32> to vector<1x128xf32>
    %12 = vector.broadcast %11 : vector<1x128xf32> to vector<10x128xf32>
    %13 = arith.subf %12, %3 : vector<10x128xf32>
    %cst_5 = arith.constant 2.000000e-01 : f32
    %14 = vector.broadcast %cst_5 : f32 to vector<10x128xf32>
    %15 = arith.subf %14, %13 : vector<10x128xf32>
    %cst_6 = arith.constant 0.000000e+00 : f32
    %16 = vector.broadcast %cst_6 : f32 to vector<10x128xf32>
    %17 = arith.maximumf %15, %16 : vector<10x128xf32>
    %18 = arith.mulf %17, %17 : vector<10x128xf32>
    %cst_7 = arith.constant dense<0.000000e+00> : vector<128xf32>
    %19 = vector.multi_reduction <add>, %18, %cst_7 [0] : vector<10x128xf32> to vector<128xf32>
    %20 = vector.shape_cast %19 : vector<128xf32> to vector<1x128xf32>
    %21 = tpu.iota {dimensions = array<i32: 1>} : vector<1x128xi32>
    %c128_i32 = arith.constant 128 : i32
    %22 = arith.muli %arg0, %c128_i32 : i32
    %23 = vector.broadcast %22 : i32 to vector<1x128xi32>
    %24 = arith.addi %21, %23 : vector<1x128xi32>
    %c8_i32 = arith.constant 8 : i32
    %25 = vector.broadcast %c8_i32 : i32 to vector<1x128xi32>
    %26 = arith.cmpi slt, %24, %25 : vector<1x128xi32>
    %cst_8 = arith.constant 0.000000e+00 : f32
    %27 = vector.broadcast %cst_8 : f32 to vector<1x128xf32>
    %28 = arith.select %26, %20, %27 : vector<1x128xi1>, vector<1x128xf32>
    %29 = vector.shape_cast %28 : vector<1x128xf32> to vector<1x1x128xf32>
    %cst_9 = arith.constant dense<0.000000e+00> : vector<1xf32>
    %30 = vector.multi_reduction <add>, %29, %cst_9 [1, 2] : vector<1x1x128xf32> to vector<1xf32>
    %31 = vector.shape_cast %30 : vector<1xf32> to vector<1x1x1xf32>
    %32 = vector.extract %31[0, 0, 0] : f32 from vector<1x1x1xf32>
    %c0_10 = arith.constant 0 : index
    %c0_11 = arith.constant 0 : index
    %33 = memref.load %arg3[%c0_10, %c0_11] : memref<1x1xf32, #tpu.memory_space<smem>>
    %34 = arith.addf %33, %32 : f32
    %c0_12 = arith.constant 0 : index
    %c0_13 = arith.constant 0 : index
    %35 = memref.load %arg3[%c0_12, %c0_13] : memref<1x1xf32, #tpu.memory_space<smem>>
    memref.store %34, %arg3[%c0_12, %c0_13] : memref<1x1xf32, #tpu.memory_space<smem>>
    %c0_i32_14 = arith.constant 0 : i32
    %36 = arith.cmpi eq, %arg0, %c0_i32_14 : i32
    %37 = arith.extui %36 : i1 to i32
    %c0_i32_15 = arith.constant 0 : i32
    %38 = arith.cmpi ne, %37, %c0_i32_15 : i32
    scf.if %38 {
      %c0_16 = arith.constant 0 : index
      %c0_17 = arith.constant 0 : index
      %39 = memref.load %arg3[%c0_16, %c0_17] : memref<1x1xf32, #tpu.memory_space<smem>>
      %cst_18 = arith.constant 1.250000e-01 : f32
      %40 = arith.mulf %39, %cst_18 : f32
      %cst_19 = arith.constant 4.000000e-02 : f32
      %41 = arith.subf %40, %cst_19 : f32
      %c0_20 = arith.constant 0 : index
      %c0_21 = arith.constant 0 : index
      %42 = memref.load %arg3[%c0_20, %c0_21] : memref<1x1xf32, #tpu.memory_space<smem>>
      memref.store %41, %arg3[%c0_20, %c0_21] : memref<1x1xf32, #tpu.memory_space<smem>>
    } else {
    }
    return
  }
  func.func @transform_0(%arg0: i32) -> (i32, i32) {
    %c0_i32 = arith.constant 0 : i32
    %c0_i32_0 = arith.constant 0 : i32
    return %c0_i32, %arg0 : i32, i32
  }
  func.func @transform_1(%arg0: i32) -> (i32, i32) {
    %c0_i32 = arith.constant 0 : i32
    %c0_i32_0 = arith.constant 0 : i32
    return %c0_i32, %arg0 : i32, i32
  }
  func.func @transform_2(%arg0: i32) -> (i32, i32) {
    %c0_i32 = arith.constant 0 : i32
    %c0_i32_0 = arith.constant 0 : i32
    %c0_i32_1 = arith.constant 0 : i32
    return %c0_i32, %c0_i32_0 : i32, i32
  }
}

</mosaic_0001>

<bundles_post_ra>
// kernel: tpu_custom_call.1
= control target key start
LH: loop header
LB: loop body
LE: loop exit
PB: predicated region body
PF: predicated region fallthrough
CT: control target
= control target key end

     0   :  { %7 = vsyncpa [#allocation3], 0  ;;  %s207_s0 = inlined_call_operand.hbm [shape: f32[10,128], index: 0, kind: input, shape index: {}]   ;;  %s208_s1 = inlined_call_operand.vmem [shape: s32[1,128], index: 1, kind: input, shape index: {}]   ;;  %s209_s2 = inlined_call_operand.hbm [shape: f32[1,1], index: 2, kind: output, shape index: {}]  }
   0x1   :  { %8 = vsyncpa [#allocation4], 0  ;;  %s159_s9 = smov [#allocation2]   ;;  %s123_s13 = scalar_lea.hbm %s207_s0, 256 }
   0x2   :  { %s14_s10 = sshll.u32 %s159_s9, 4  ;;  %p124_p0 = scmp.ne.s32.totalorder %s207_s0, %s123_s13  ;;  %s15_s10 = int_to_ptr.vmem [resolvable:$true] %s14_s10 }
   0x3   :  { %p127_p1 = scmp.lt.u32.totalorder %s123_s13, %s207_s0 }
   0x5   :  { %p129_p2 = pnand %p127_p1, %p124_p0 }
   0x7   :  { %132 = shalt.err (!%p129_p2)
}
   0x8   :  { %s133_s18 = scalar_lea.vmem %s15_s10, 256  ;;  %p138_p4 = scmp.lt.s32.totalorder %s15_s10, %s15_s10 }
   0x9   :  { %p134_p3 = scmp.ne.s32.totalorder %s15_s10, %s133_s18  ;;  %p139_p5 = scmp.lt.s32.totalorder %s133_s18, %s133_s18 }
   0xb   :  { %p140_p6 = por %p139_p5, %p138_p4 }
   0xd   :  { %p141_p7 = pnand %p140_p6, %p134_p3 }
   0xf   :  { %144 = shalt.err (!%p141_p7)
}
  0x10   :  { %s160_s19 = smov 128   ;;  %s161_s20 = smov 8  }
  0x11   :  { %20 = dma.hbm_to_vmem [thread:$0]  %s207_s0, 256, %s15_s10, [#allocation3], %s160_s19, %s160_s19, %s161_s20  }
  0x12   :  { %155 = dma.done.wait [#allocation3], 256  }
  0x13   :  { %156 = vsyncadd [#allocation3], 4294967040  ;;  %v35_v0 = vlaneseq  ;;  %v32_v3 = vld [vmem:[#allocation2] sm:$0xff]  ;;  %v33_v4 = vld [vmem:[#allocation2 + $0x8] sm:$0x3]  ;;  %vm46_vm0 = vcmask 1041408  }
  0x14   :  { %v114_v5 = vld [vmem:[%s208_s1] ss:$0 sm:$0xff]  ;;  %vm78_vm4 = vcmask 1040384   ;;  %s145_s28 = scalar_lea.hbm %s209_s2, 16 }
  0x15   :  { %v36_v1 = vshrl.u32 %v35_v0, 7  ;;  %v72_v29 = vand.u32 127, %v35_v0  ;;  %p146_p8 = scmp.ne.s32.totalorder %s209_s2, %s145_s28  ;;  %p149_p9 = scmp.lt.u32.totalorder %s145_s28, %s209_s2 }
  0x17   :  { %v37_v2 = vadd.s32 8, %v36_v1  ;;  %vm42_vm1 = vcmp.eq.s32.totalorder %v36_v1, %v114_v5  ;;  %vm76_vm3 = vcmp.lt.s32.totalorder %v72_v29, 8  ;;  %p151_p10 = pnand %p149_p9, %p146_p8 }
  0x18   :  { %v44_v6 = vsel %vm42_vm1, %v32_v3, 0.0 }
  0x19   :  { %vm43_vm2 = vcmp.eq.s32.totalorder %v37_v2, %v114_v5 }
  0x1a   :  { %v45_v7 = vsel %vm43_vm2, %v33_v4, 0.0 }
  0x1b   :  { %v47_v8 = vsel %vm46_vm0, %v45_v7, 0.0 }
  0x1c   :  { %v48_v9 = vadd.f32 %v47_v8, %v44_v6 }
  0x1e   :  { %v49_v10 = vrot.slane %v48_v9, 4 }
  0x20   :  { %v50_v11 = vadd.f32 %v49_v10, %v48_v9 }
  0x22   :  { %v51_v12 = vrot.slane %v50_v11, 2 }
  0x24   :  { %v52_v13 = vadd.f32 %v51_v12, %v50_v11 }
  0x26   :  { %v53_v14 = vrot.slane %v52_v13, 1 }
  0x28   :  { %v54_v15 = vadd.f32 %v53_v14, %v52_v13 }
  0x2a   :  { %v55_v16 = vsub.f32 %v54_v15, %v32_v3  ;;  %v56_v17 = vsub.f32 %v54_v15, %v33_v4 }
  0x2c   :  { %v57_v18 = vsub.f32 0.2, %v55_v16  ;;  %v58_v19 = vsub.f32 0.2, %v56_v17 }
  0x2e   :  { %v59_v20 = vmax.f32 %v57_v18, 0.0  ;;  %v60_v21 = vmax.f32 %v58_v19, 0.0 }
  0x30   :  { %v61_v22 = vmul.f32 %v59_v20, %v59_v20  ;;  %v62_v23 = vmul.f32 %v60_v21, %v60_v21 }
  0x32   :  { %v63_v24 = vsel %vm46_vm0, %v62_v23, 0.0 }
  0x33   :  { %v64_v25 = vadd.f32 %v63_v24, %v61_v22 }
  0x35   :  { %v65_v26 = vrot.slane %v64_v25, 4 }
  0x37   :  { %v66_v27 = vadd.f32 %v65_v26, %v64_v25 }
  0x39   :  { %v67_v28 = vrot.slane %v66_v27, 2 }
  0x3b   :  { %v68_v30 = vadd.f32 %v67_v28, %v66_v27 }
  0x3d   :  { %v69_v31 = vrot.slane %v68_v30, 1 }
  0x3f   :  { %v70_v32 = vadd.f32 %v69_v31, %v68_v30 }
  0x41   :  { %v77_v33 = vsel %vm76_vm3, %v70_v32, 0.0 }
  0x42   :  { %v79_v34 = vsel %vm78_vm4, %v77_v33, 0.0 }
  0x43   :  { %80 = vadd.xlane.f32.xlu0 %v79_v34 }
  0xd0   :  { %v81_v35 = vpop.xlane.xlu0 %80 }
  0xd1   :  { %v82_v36 = vrot.slane %v81_v35, 4 }
  0xd3   :  { %v83_v37 = vadd.f32 %v82_v36, %v81_v35 }
  0xd5   :  { %v84_v38 = vrot.slane %v83_v37, 2 }
  0xd7   :  { %v85_v39 = vadd.f32 %v84_v38, %v83_v37 }
  0xd9   :  { %v86_v40 = vrot.slane %v85_v39, 1 }
  0xdb   :  { %v87_v41 = vadd.f32 %v86_v40, %v85_v39 }
  0xdd   :  { %116 = vpush %v87_v41 }
 0x10e   :  { %s117_s0 = spop %116 }
 0x10f   :  { %s97_s1 = smul.f32 0.125, %s117_s0 }
 0x111   :  { %s115_s25 = sadd.f32 -0.04, %s97_s1 }
 0x113   :  { %99 = sst [smem:[#allocation5]] %s115_s25 }
 0x114   :  { %154 = shalt.err (!%p151_p10)
}
 0x115   :  { %s162_s5 = smov [#allocation5]  }
 0x116   :  { %107 = dma.smem_to_hbm %s162_s5, 16, %s209_s2, [#allocation4]  }
 0x117   :  { %157 = dma.done.wait [#allocation4], 16  }
 0x118   :  { %158 = vsyncadd [#allocation4], 4294967280 }
 0x119   :  { %111 = sfence }
 0x11a   :  { %112 = vsyncpa [#allocation3], 1 }
 0x11b   :  { %113 = vsyncpa [#allocation4], 1 }

</bundles_post_ra>
